<compile_context>
chip_gen: v7x
topology: tpu7x:2x2x1
jax: 0.10.0
libtpu: 0.0.40
codegen_flags: <defaults>
</compile_context>

<pallas_src>
import jax
import jax.numpy as jnp
from jax.experimental import pallas as pl
from jax.experimental.pallas import tpu as pltpu

HIDDEN = 1024  # fixed by the module


def _round_up(x, m):
    return (x + m - 1) // m * m


def _fused_linear_relu_single_kernel(x_ref, w_ref, b_ref, o_ref):
    # Grid: (branch i in {src, tgt},)
    # x_ref: (1, B, Kp)  w_ref: (1, Kp, N)  b_ref: (1, 1, N)  o_ref: (1, B, N)
    acc = jnp.dot(x_ref[0], w_ref[0], preferred_element_type=jnp.float32)
    o_ref[0] = jnp.maximum(acc + b_ref[0], 0.0).astype(o_ref.dtype)


def _fused_linear_relu_ktiled_kernel(x_ref, w_ref, b_ref, o_ref, acc_ref):
    # Grid: (branch i in {src, tgt}, k tile)  -- k is the reduction axis (last).
    # x_ref: (1, B, tk)   w_ref: (1, tk, N)   b_ref: (1, 1, N)
    # o_ref: (1, B, N)    acc_ref: (B, N) f32 scratch
    k = pl.program_id(1)

    @pl.when(k == 0)
    def _():
        acc_ref[...] = jnp.zeros_like(acc_ref)

    acc_ref[...] += jnp.dot(x_ref[0], w_ref[0],
                            preferred_element_type=jnp.float32)

    @pl.when(k == pl.num_programs(1) - 1)
    def _():
        o_ref[0] = jnp.maximum(acc_ref[...] + b_ref[0], 0.0).astype(o_ref.dtype)


def contrastive_network_forward(x1, x2, params, *, tk_max=512):
    """Pallas equivalent of ContrastiveNetwork.forward (single fused launch)."""
    w1, b1 = params["w_src_t"], params["b_src"]
    w2, b2 = params["w_tgt_t"], params["b_tgt"]
    B, K1 = x1.shape
    B2, K2 = x2.shape
    assert B == B2, "both branches must share the batch dimension"
    N = HIDDEN
    assert w1.shape == (K1, N) and w2.shape == (K2, N)
    assert b1.shape == (N,) and b2.shape == (N,)
    assert tk_max % 128 == 0

    # Pad batch to a sublane multiple so small/odd batches lower cleanly.
    Bp = _round_up(max(B, 8), 8)

    # Pad the contraction dim of both branches to a common 128-aligned size so
    # they can be stacked into one launch; zero padding is exact for matmul.
    Kp = _round_up(max(K1, K2), 128)
    tk = min(Kp, tk_max)
    Kp = _round_up(Kp, tk)
    n_k = Kp // tk

    def pad_to(a, shape):
        pad = [(0, t - s) for s, t in zip(a.shape, shape)]
        if all(p == (0, 0) for p in pad):
            return a
        return jnp.pad(a, pad)

    xs = jnp.stack([pad_to(x1, (Bp, Kp)), pad_to(x2, (Bp, Kp))])  # (2, Bp, Kp)
    ws = jnp.stack([pad_to(w1, (Kp, N)), pad_to(w2, (Kp, N))])    # (2, Kp, N)
    bs = jnp.stack([b1.reshape(1, N), b2.reshape(1, N)])          # (2, 1, N)

    cost = pl.CostEstimate(
        flops=4 * Bp * Kp * N,                # 2 branches x 2*B*Kp*N
        transcendentals=0,
        bytes_accessed=4 * (2 * Bp * Kp + 2 * Kp * N + 2 * N + 2 * Bp * N),
    )

    if n_k == 1:
        # Fast path: whole reduction in one MXU pass, no scratch / no pl.when.
        grid_spec = pltpu.PrefetchScalarGridSpec(
            num_scalar_prefetch=0,
            grid=(2,),
            in_specs=[
                pl.BlockSpec((1, Bp, Kp), lambda i: (i, 0, 0)),   # x
                pl.BlockSpec((1, Kp, N), lambda i: (i, 0, 0)),    # W
                pl.BlockSpec((1, 1, N), lambda i: (i, 0, 0)),     # bias
            ],
            out_specs=pl.BlockSpec((1, Bp, N), lambda i: (i, 0, 0)),
            scratch_shapes=[],
        )
        kernel = _fused_linear_relu_single_kernel
        dims = ("parallel",)
    else:
        # Large-K path: tile the reduction, accumulate in f32 VMEM scratch.
        grid_spec = pltpu.PrefetchScalarGridSpec(
            num_scalar_prefetch=0,
            grid=(2, n_k),
            in_specs=[
                pl.BlockSpec((1, Bp, tk), lambda i, k: (i, 0, k)),  # x tile
                pl.BlockSpec((1, tk, N), lambda i, k: (i, k, 0)),   # W tile
                pl.BlockSpec((1, 1, N), lambda i, k: (i, 0, 0)),    # bias (resident)
            ],
            out_specs=pl.BlockSpec((1, Bp, N), lambda i, k: (i, 0, 0)),
            scratch_shapes=[pltpu.VMEM((Bp, N), jnp.float32)],
        )
        kernel = _fused_linear_relu_ktiled_kernel
        dims = ("parallel", "arbitrary")

    out = pl.pallas_call(
        kernel,
        out_shape=jax.ShapeDtypeStruct((2, Bp, N), jnp.float32),
        grid_spec=grid_spec,
        compiler_params=pltpu.CompilerParams(dimension_semantics=dims),
        cost_estimate=cost,
    )(xs, ws, bs)

    return out[0, :B], out[1, :B]


def init_params(key, input_dim_source, input_dim_target):
    """Deterministic synthetic init (Kaiming-uniform-ish like nn.Linear)."""
    k1, k2, k3, k4 = jax.random.split(key, 4)
    bound_s = 1.0 / jnp.sqrt(input_dim_source)
    bound_t = 1.0 / jnp.sqrt(input_dim_target)
    # Store weights already transposed: (in_features, 1024)
    w_src_t = jax.random.uniform(
        k1, (input_dim_source, HIDDEN), jnp.float32, -bound_s, bound_s)
    b_src = jax.random.uniform(k2, (HIDDEN,), jnp.float32, -bound_s, bound_s)
    w_tgt_t = jax.random.uniform(
        k3, (input_dim_target, HIDDEN), jnp.float32, -bound_t, bound_t)
    b_tgt = jax.random.uniform(k4, (HIDDEN,), jnp.float32, -bound_t, bound_t)
    return {"w_src_t": w_src_t, "b_src": b_src,
            "w_tgt_t": w_tgt_t, "b_tgt": b_tgt}


if __name__ == "__main__":
    key = jax.random.PRNGKey(0)
    batch = 8                       # callers should batch >=128 rows for MXU utilization
    input_dim_source = 32
    input_dim_target = 64

    kp, kx1, kx2 = jax.random.split(key, 3)
    params = init_params(kp, input_dim_source, input_dim_target)
    x1 = jax.random.normal(kx1, (batch, input_dim_source), jnp.float32)
    x2 = jax.random.normal(kx2, (batch, input_dim_target), jnp.float32)

    out1, out2 = jax.jit(contrastive_network_forward)(x1, x2, params)
    jax.block_until_ready((out1, out2))

    # Reference check against plain JAX (same math as torch.relu(Linear(x)))
    ref1 = jnp.maximum(x1 @ params["w_src_t"] + params["b_src"], 0.0)
    ref2 = jnp.maximum(x2 @ params["w_tgt_t"] + params["b_tgt"], 0.0)
    assert out1.shape == (batch, HIDDEN) and out2.shape == (batch, HIDDEN)
    assert jnp.allclose(out1, ref1, atol=1e-5, rtol=1e-5)
    assert jnp.allclose(out2, ref2, atol=1e-5, rtol=1e-5)

    print("KERNEL_OK")
</pallas_src>

<mosaic_0001>
module attributes {stable_mosaic.version = 11 : i64} {
  func.func @_fused_linear_relu_single_kernel(%arg0: i32, %arg1: memref<1x8x128xf32, #tpu.memory_space<vmem>>, %arg2: memref<1x128x1024xf32, #tpu.memory_space<vmem>>, %arg3: memref<1x1x1024xf32, #tpu.memory_space<vmem>>, %arg4: memref<1x8x1024xf32, #tpu.memory_space<vmem>>) attributes {dimension_semantics = [#tpu.dimension_semantics<parallel>], iteration_bounds = array<i64: 2>, scalar_prefetch = 0 : i64, scratch_operands = 0 : i64, tpu.core_type = #tpu.core_type<tc>, window_params = [{transform_indices = @transform_0, window_bounds = array<i64: 1, 8, 128>}, {transform_indices = @transform_1, window_bounds = array<i64: 1, 128, 1024>}, {transform_indices = @transform_2, window_bounds = array<i64: 1, 1, 1024>}, {transform_indices = @transform_3, window_bounds = array<i64: 1, 8, 1024>}]} {
    %c0 = arith.constant 0 : index
    %c0_0 = arith.constant 0 : index
    %c0_1 = arith.constant 0 : index
    %0 = vector.load %arg1[%c0, %c0_0, %c0_1] : memref<1x8x128xf32, #tpu.memory_space<vmem>>, vector<1x8x128xf32>
    %1 = vector.shape_cast %0 : vector<1x8x128xf32> to vector<8x128xf32>
    %c0_2 = arith.constant 0 : index
    %c0_3 = arith.constant 0 : index
    %c0_4 = arith.constant 0 : index
    %2 = vector.load %arg2[%c0_2, %c0_3, %c0_4] : memref<1x128x1024xf32, #tpu.memory_space<vmem>>, vector<1x128x1024xf32>
    %3 = vector.shape_cast %2 : vector<1x128x1024xf32> to vector<128x1024xf32>
    %cst = arith.constant dense<0.000000e+00> : vector<8x1024xf32>
    %4 = tpu.matmul %1, %3, %cst {dimension_numbers = #tpu.dot_dimension_numbers<[1], [0], [0], [1], [0, 0, 1, 1], [], []>} : vector<8x128xf32>, vector<128x1024xf32>, vector<8x1024xf32> -> vector<8x1024xf32>
    %c0_5 = arith.constant 0 : index
    %c0_6 = arith.constant 0 : index
    %c0_7 = arith.constant 0 : index
    %5 = vector.load %arg3[%c0_5, %c0_6, %c0_7] : memref<1x1x1024xf32, #tpu.memory_space<vmem>>, vector<1x1x1024xf32>
    %6 = vector.shape_cast %5 : vector<1x1x1024xf32> to vector<1x1024xf32>
    %7 = vector.broadcast %6 : vector<1x1024xf32> to vector<8x1024xf32>
    %8 = arith.addf %4, %7 : vector<8x1024xf32>
    %cst_8 = arith.constant 0.000000e+00 : f32
    %9 = vector.broadcast %cst_8 : f32 to vector<8x1024xf32>
    %10 = arith.maximumf %8, %9 : vector<8x1024xf32>
    %c0_9 = arith.constant 0 : index
    %c0_10 = arith.constant 0 : index
    %c0_11 = arith.constant 0 : index
    %11 = vector.load %arg4[%c0_9, %c0_10, %c0_11] : memref<1x8x1024xf32, #tpu.memory_space<vmem>>, vector<1x8x1024xf32>
    %12 = vector.shape_cast %11 : vector<1x8x1024xf32> to vector<8x1024xf32>
    %13 = vector.shape_cast %10 : vector<8x1024xf32> to vector<1x8x1024xf32>
    tpu.vector_store %arg4[%c0_9, %c0_10, %c0_11], %13 {strides = array<i32>} : memref<1x8x1024xf32, #tpu.memory_space<vmem>>, vector<1x8x1024xf32>,
    return
  }
  func.func @transform_0(%arg0: i32) -> (i32, i32, i32) {
    %c0_i32 = arith.constant 0 : i32
    %c0_i32_0 = arith.constant 0 : i32
    %c0_i32_1 = arith.constant 0 : i32
    return %arg0, %c0_i32, %c0_i32_0 : i32, i32, i32
  }
  func.func @transform_1(%arg0: i32) -> (i32, i32, i32) {
    %c0_i32 = arith.constant 0 : i32
    %c0_i32_0 = arith.constant 0 : i32
    %c0_i32_1 = arith.constant 0 : i32
    return %arg0, %c0_i32, %c0_i32_0 : i32, i32, i32
  }
  func.func @transform_2(%arg0: i32) -> (i32, i32, i32) {
    %c0_i32 = arith.constant 0 : i32
    %c0_i32_0 = arith.constant 0 : i32
    %c0_i32_1 = arith.constant 0 : i32
    return %arg0, %c0_i32, %c0_i32_0 : i32, i32, i32
  }
  func.func @transform_3(%arg0: i32) -> (i32, i32, i32) {
    %c0_i32 = arith.constant 0 : i32
    %c0_i32_0 = arith.constant 0 : i32
    %c0_i32_1 = arith.constant 0 : i32
    return %arg0, %c0_i32, %c0_i32_0 : i32, i32, i32
  }
}

</mosaic_0001>

<bundles_post_ra>
// kernel: contrastive_network_forward.1
= control target key start
LH: loop header
LB: loop body
LE: loop exit
PB: predicated region body
PF: predicated region fallthrough
CT: control target
= control target key end

     0   :  { %s936_s12 = smov 0   ;;  %s1118_s0 = inlined_call_operand.vmem [shape: f32[2,8,128], index: 0, kind: input, shape index: {}]   ;;  %s1119_s1 = inlined_call_operand.vmem [shape: f32[2,128,1024], index: 1, kind: input, shape index: {}]   ;;  %s1120_s2 = inlined_call_operand.vmem [shape: f32[2,1,1024], index: 2, kind: input, shape index: {}]   ;;  %s1121_s3 = inlined_call_operand.vmem [shape: f32[2,8,1024], index: 3, kind: output, shape index: {}]  }
   0x1 LB: > { %s755_s13 = sadd.s32 4294967295, %s913_s12   ;;  %p759_p0 = scmp.ge.s32.totalorder %s913_s12, 1  ;;  %s913_s12 = sphi %s936_s12, %s13_s12  }
   0x2   : > { %p155_p1 = scmp.lt.s32.totalorder %s913_s12, 3 }
   0x4   : > { %p156_p2 = pnand %p759_p0, %p155_p1 }
   0x5   : > { %p187_p3 = scmp.lt.s32.totalorder (!%p156_p2), %s755_s13, 1  ;;  %v915_v0 = vmov (!%p156_p2), 0.0  }
   0x6   : > { %159 = sbr.rel (%p156_p2) target bundleno = 303 (0x12f), region = 32  ;;  %440 = vmatprep.mubr.f32.mxu0 (!%p156_p2), %v915_v0  ;;  %511 = vmatprep.mubr.f32.mxu1 (!%p156_p2), %v915_v0 }
   0xd   : > { %s1123_s13 = smov (!%p187_p3, %s755_s13), 1 }
   0xe   : > { %s768_s14 = sshll.u32 %s1123_s13, 10  ;;  %s760_s18 = sshll.u32 %s1123_s13, 3 }
   0xf   : > { %s952_s17 = scalar_lea.vmem %s1119_s1, %s768_s14  ;;  %s190_s21 = scalar_lea.vmem %s1118_s0, %s760_s18 }
  0x10   : > { %v207_v1 = vld [vmem:[%s952_s17 + $0x8] sm:$0xff]  ;;  %v209_v3 = vld [vmem:[%s952_s17 + $0x18] sm:$0xff]  ;;  %v206_v6 = vld [vmem:[%s952_s17] sm:$0xff]  ;;  %s199_s24 = scalar_lea.vmem %s1120_s2, %s760_s18  ;;  %s769_s25 = sshll.u32 %s1123_s13, 6 }
  0x11   : > { %v215_v2 = vld [vmem:[%s952_s17 + $0x48] sm:$0xff]  ;;  %v217_v5 = vld [vmem:[%s952_s17 + $0x58] sm:$0xff]  ;;  %v214_v7 = vld [vmem:[%s952_s17 + $0x40] sm:$0xff]  ;;  %s1105_s28 = scalar_lea.vmem %s1121_s3, %s769_s25 }
  0x12   : > { %v770_v4 = vpack.c.bf16 %v215_v2, %v207_v1  ;;  %v802_v8 = vpack.c.bf16 %v217_v5, %v209_v3  ;;  %v772_v9 = vpack.c.bf16 %v214_v7, %v206_v6  ;;  %v208_v10 = vld [vmem:[%s952_s17 + $0x10] sm:$0xff]  ;;  %v223_v12 = vld [vmem:[%s952_s17 + $0x88] sm:$0xff]  ;;  %v225_v15 = vld [vmem:[%s952_s17 + $0x98] sm:$0xff] }
  0x13   : > { %v216_v11 = vld [vmem:[%s952_s17 + $0x50] sm:$0xff]  ;;  %v231_v14 = vld [vmem:[%s952_s17 + $0xc8] sm:$0xff]  ;;  %v233_v16 = vld [vmem:[%s952_s17 + $0xd8] sm:$0xff] }
  0x14   : > { %771 = vmatprep.subr.bf16.mxu0 %v770_v4  ;;  %v804_v13 = vpack.c.bf16 %v216_v11, %v208_v10  ;;  %803 = vmatprep.subr.bf16.mxu1 %v802_v8  ;;  %v774_v17 = vpack.c.bf16 %v231_v14, %v223_v12  ;;  %v806_v18 = vpack.c.bf16 %v233_v16, %v225_v15  ;;  %v222_v19 = vld [vmem:[%s952_s17 + $0x80] sm:$0xff]  ;;  %v224_v21 = vld [vmem:[%s952_s17 + $0x90] sm:$0xff]  ;;  %v239_v24 = vld [vmem:[%s952_s17 + $0x108] sm:$0xff] }
  0x15   : > { %773 = vmatpush1.bf16.msra.mxu0 %v772_v9  ;;  %v230_v20 = vld [vmem:[%s952_s17 + $0xc0] sm:$0xff]  ;;  %v232_v23 = vld [vmem:[%s952_s17 + $0xd0] sm:$0xff]  ;;  %v247_v25 = vld [vmem:[%s952_s17 + $0x148] sm:$0xff] }
  0x16   : > { %805 = vmatpush1.bf16.msra.mxu1 %v804_v13  ;;  %v776_v22 = vpack.c.bf16 %v230_v20, %v222_v19  ;;  %775 = vmatprep.subr.bf16.mxu0 %v774_v17  ;;  %v808_v26 = vpack.c.bf16 %v232_v23, %v224_v21  ;;  %v778_v27 = vpack.c.bf16 %v247_v25, %v239_v24  ;;  %v241_v28 = vld [vmem:[%s952_s17 + $0x118] sm:$0xff]  ;;  %v238_v30 = vld [vmem:[%s952_s17 + $0x100] sm:$0xff]  ;;  %v240_v33 = vld [vmem:[%s952_s17 + $0x110] sm:$0xff] }
  0x17   : > { %807 = vmatprep.subr.bf16.mxu1 %v806_v18  ;;  %v249_v29 = vld [vmem:[%s952_s17 + $0x158] sm:$0xff]  ;;  %v246_v32 = vld [vmem:[%s952_s17 + $0x140] sm:$0xff]  ;;  %v248_v34 = vld [vmem:[%s952_s17 + $0x150] sm:$0xff] }
  0x18   : > { %v810_v31 = vpack.c.bf16 %v249_v29, %v241_v28  ;;  %v780_v35 = vpack.c.bf16 %v246_v32, %v238_v30  ;;  %v255_v36 = vld [vmem:[%s952_s17 + $0x188] sm:$0xff]  ;;  %v257_v38 = vld [vmem:[%s952_s17 + $0x198] sm:$0xff]  ;;  %v812_v39 = vpack.c.bf16 %v248_v34, %v240_v33  ;;  %v254_v42 = vld [vmem:[%s952_s17 + $0x180] sm:$0xff] }
  0x19   : > { %777 = vmatpush1.bf16.msra.mxu0 %v776_v22  ;;  %v263_v37 = vld [vmem:[%s952_s17 + $0x1c8] sm:$0xff]  ;;  %v265_v41 = vld [vmem:[%s952_s17 + $0x1d8] sm:$0xff]  ;;  %v262_v43 = vld [vmem:[%s952_s17 + $0x1c0] sm:$0xff] }
  0x1a   : > { %809 = vmatpush1.bf16.msra.mxu1 %v808_v26  ;;  %779 = vmatprep.subr.bf16.mxu0 %v778_v27  ;;  %v782_v40 = vpack.c.bf16 %v263_v37, %v255_v36  ;;  %v814_v44 = vpack.c.bf16 %v265_v41, %v257_v38  ;;  %v256_v45 = vld [vmem:[%s952_s17 + $0x190] sm:$0xff]  ;;  %v271_v47 = vld [vmem:[%s952_s17 + $0x208] sm:$0xff]  ;;  %v273_v49 = vld [vmem:[%s952_s17 + $0x218] sm:$0xff]  ;;  %v784_v51 = vpack.c.bf16 %v262_v43, %v254_v42 }
  0x1b   : > { %811 = vmatprep.subr.bf16.mxu1 %v810_v31  ;;  %v264_v46 = vld [vmem:[%s952_s17 + $0x1d0] sm:$0xff]  ;;  %v279_v48 = vld [vmem:[%s952_s17 + $0x248] sm:$0xff]  ;;  %v281_v50 = vld [vmem:[%s952_s17 + $0x258] sm:$0xff] }
  0x1c   : > { %v816_v52 = vpack.c.bf16 %v264_v46, %v256_v45  ;;  %v786_v53 = vpack.c.bf16 %v279_v48, %v271_v47  ;;  %v270_v54 = vld [vmem:[%s952_s17 + $0x200] sm:$0xff]  ;;  %v272_v56 = vld [vmem:[%s952_s17 + $0x210] sm:$0xff]  ;;  %v818_v57 = vpack.c.bf16 %v281_v50, %v273_v49  ;;  %v287_v59 = vld [vmem:[%s952_s17 + $0x288] sm:$0xff] }
  0x1d   : > { %781 = vmatpush1.bf16.msra.mxu0 %v780_v35  ;;  %v278_v55 = vld [vmem:[%s952_s17 + $0x240] sm:$0xff]  ;;  %v280_v58 = vld [vmem:[%s952_s17 + $0x250] sm:$0xff]  ;;  %v295_v60 = vld [vmem:[%s952_s17 + $0x2c8] sm:$0xff] }
  0x1e   : > { %813 = vmatpush1.bf16.msra.mxu1 %v812_v39  ;;  %783 = vmatprep.subr.bf16.mxu0 %v782_v40  ;;  %v289_v61 = vld [vmem:[%s952_s17 + $0x298] sm:$0xff]  ;;  %v788_v63 = vpack.c.bf16 %v278_v55, %v270_v54  ;;  %v820_v1 = vpack.c.bf16 %v280_v58, %v272_v56  ;;  %v790_v2 = vpack.c.bf16 %v295_v60, %v287_v59  ;;  %v286_v3 = vld [vmem:[%s952_s17 + $0x280] sm:$0xff]  ;;  %v288_v5 = vld [vmem:[%s952_s17 + $0x290] sm:$0xff] }
  0x1f   : > { %815 = vmatprep.subr.bf16.mxu1 %v814_v44  ;;  %v297_v62 = vld [vmem:[%s952_s17 + $0x2d8] sm:$0xff]  ;;  %v294_v4 = vld [vmem:[%s952_s17 + $0x2c0] sm:$0xff]  ;;  %v296_v7 = vld [vmem:[%s952_s17 + $0x2d0] sm:$0xff] }
  0x20   : > { %v822_v6 = vpack.c.bf16 %v297_v62, %v289_v61  ;;  %v303_v8 = vld [vmem:[%s952_s17 + $0x308] sm:$0xff]  ;;  %v305_v10 = vld [vmem:[%s952_s17 + $0x318] sm:$0xff]  ;;  %v792_v12 = vpack.c.bf16 %v294_v4, %v286_v3  ;;  %v824_v13 = vpack.c.bf16 %v296_v7, %v288_v5  ;;  %v302_v15 = vld [vmem:[%s952_s17 + $0x300] sm:$0xff] }
  0x21   : > { %785 = vmatpush1.bf16.msra.mxu0 %v784_v51  ;;  %v311_v9 = vld [vmem:[%s952_s17 + $0x348] sm:$0xff]  ;;  %v313_v11 = vld [vmem:[%s952_s17 + $0x358] sm:$0xff]  ;;  %v310_v16 = vld [vmem:[%s952_s17 + $0x340] sm:$0xff] }
  0x22   : > { %817 = vmatpush1.bf16.msra.mxu1 %v816_v52  ;;  %787 = vmatprep.subr.bf16.mxu0 %v786_v53  ;;  %v794_v14 = vpack.c.bf16 %v311_v9, %v303_v8  ;;  %v304_v17 = vld [vmem:[%s952_s17 + $0x310] sm:$0xff]  ;;  %v826_v18 = vpack.c.bf16 %v313_v11, %v305_v10  ;;  %v319_v20 = vld [vmem:[%s952_s17 + $0x388] sm:$0xff]  ;;  %v321_v22 = vld [vmem:[%s952_s17 + $0x398] sm:$0xff]  ;;  %v796_v24 = vpack.c.bf16 %v310_v16, %v302_v15 }
  0x23   : > { %819 = vmatprep.subr.bf16.mxu1 %v818_v57  ;;  %v312_v19 = vld [vmem:[%s952_s17 + $0x350] sm:$0xff]  ;;  %v327_v21 = vld [vmem:[%s952_s17 + $0x3c8] sm:$0xff]  ;;  %v329_v23 = vld [vmem:[%s952_s17 + $0x3d8] sm:$0xff] }
  0x24   : > { %v828_v25 = vpack.c.bf16 %v312_v19, %v304_v17  ;;  %v798_v26 = vpack.c.bf16 %v327_v21, %v319_v20  ;;  %v318_v27 = vld [vmem:[%s952_s17 + $0x380] sm:$0xff]  ;;  %v320_v29 = vld [vmem:[%s952_s17 + $0x390] sm:$0xff]  ;;  %v830_v30 = vpack.c.bf16 %v329_v23, %v321_v22  ;;  %v211_v32 = vld [vmem:[%s952_s17 + $0x28] sm:$0xff] }
  0x25   : > { %789 = vmatpush1.bf16.msra.mxu0 %v788_v63  ;;  %v326_v28 = vld [vmem:[%s952_s17 + $0x3c0] sm:$0xff]  ;;  %v328_v31 = vld [vmem:[%s952_s17 + $0x3d0] sm:$0xff]  ;;  %v219_v33 = vld [vmem:[%s952_s17 + $0x68] sm:$0xff] }
  0x26   : > { %821 = vmatpush1.bf16.msra.mxu1 %v820_v1  ;;  %791 = vmatprep.subr.bf16.mxu0 %v790_v2  ;;  %v213_v34 = vld [vmem:[%s952_s17 + $0x38] sm:$0xff]  ;;  %v800_v36 = vpack.c.bf16 %v326_v28, %v318_v27  ;;  %v832_v37 = vpack.c.bf16 %v328_v31, %v320_v29  ;;  %v834_v38 = vpack.c.bf16 %v219_v33, %v211_v32  ;;  %v210_v39 = vld [vmem:[%s952_s17 + $0x20] sm:$0xff]  ;;  %v212_v41 = vld [vmem:[%s952_s17 + $0x30] sm:$0xff] }
  0x27   : > { %823 = vmatprep.subr.bf16.mxu1 %v822_v6  ;;  %v221_v35 = vld [vmem:[%s952_s17 + $0x78] sm:$0xff]  ;;  %v218_v40 = vld [vmem:[%s952_s17 + $0x60] sm:$0xff]  ;;  %v220_v43 = vld [vmem:[%s952_s17 + $0x70] sm:$0xff] }
  0x28   : > { %v866_v42 = vpack.c.bf16 %v221_v35, %v213_v34  ;;  %v227_v44 = vld [vmem:[%s952_s17 + $0xa8] sm:$0xff]  ;;  %v229_v46 = vld [vmem:[%s952_s17 + $0xb8] sm:$0xff]  ;;  %v1036_v48 = vld [vmem:[%s190_s21] sm:$0xff]  ;;  %v836_v49 = vpack.c.bf16 %v218_v40, %v210_v39  ;;  %v868_v50 = vpack.c.bf16 %v220_v43, %v212_v41 }
  0x29   : > { %793 = vmatpush1.bf16.msra.mxu0 %v792_v12  ;;  %v235_v45 = vld [vmem:[%s952_s17 + $0xe8] sm:$0xff]  ;;  %v237_v47 = vld [vmem:[%s952_s17 + $0xf8] sm:$0xff]  ;;  %v226_v52 = vld [vmem:[%s952_s17 + $0xa0] sm:$0xff] }
  0x2a   : > { %825 = vmatpush1.bf16.msra.mxu1 %v824_v13  ;;  %795 = vmatprep.subr.bf16.mxu0 %v794_v14  ;;  %v838_v51 = vpack.c.bf16 %v235_v45, %v227_v44  ;;  %v234_v53 = vld [vmem:[%s952_s17 + $0xe0] sm:$0xff]  ;;  %v228_v54 = vld [vmem:[%s952_s17 + $0xb0] sm:$0xff]  ;;  %v870_v55 = vpack.c.bf16 %v237_v47, %v229_v46  ;;  %v243_v57 = vld [vmem:[%s952_s17 + $0x128] sm:$0xff] }
  0x2b   : > { %827 = vmatprep.subr.bf16.mxu1 %v826_v18  ;;  %v236_v56 = vld [vmem:[%s952_s17 + $0xf0] sm:$0xff]  ;;  %v251_v58 = vld [vmem:[%s952_s17 + $0x168] sm:$0xff]  ;;  %v245_v59 = vld [vmem:[%s952_s17 + $0x138] sm:$0xff]  ;;  %v840_v61 = vpack.c.bf16 %v234_v53, %v226_v52 }
  0x2c   : > { %v253_v60 = vld [vmem:[%s952_s17 + $0x178] sm:$0xff]  ;;  %v872_v62 = vpack.c.bf16 %v236_v56, %v228_v54  ;;  %v842_v63 = vpack.c.bf16 %v251_v58, %v243_v57  ;;  %v242_v1 = vld [vmem:[%s952_s17 + $0x120] sm:$0xff]  ;;  %v244_v3 = vld [vmem:[%s952_s17 + $0x130] sm:$0xff] }
  0x2d   : > { %797 = vmatpush1.bf16.msra.mxu0 %v796_v24  ;;  %v250_v2 = vld [vmem:[%s952_s17 + $0x160] sm:$0xff]  ;;  %v874_v4 = vpack.c.bf16 %v253_v60, %v245_v59  ;;  %v252_v5 = vld [vmem:[%s952_s17 + $0x170] sm:$0xff]  ;;  %v259_v6 = vld [vmem:[%s952_s17 + $0x1a8] sm:$0xff] }
  0x2e   : > { %829 = vmatpush1.bf16.msra.mxu1 %v828_v25  ;;  %799 = vmatprep.subr.bf16.mxu0 %v798_v26  ;;  %v267_v7 = vld [vmem:[%s952_s17 + $0x1e8] sm:$0xff]  ;;  %v261_v8 = vld [vmem:[%s952_s17 + $0x1b8] sm:$0xff]  ;;  %v844_v10 = vpack.c.bf16 %v250_v2, %v242_v1  ;;  %v876_v11 = vpack.c.bf16 %v252_v5, %v244_v3  ;;  %v258_v13 = vld [vmem:[%s952_s17 + $0x1a0] sm:$0xff]  ;;  %v336_v5 = vlaneseq }
  0x2f   : > { %831 = vmatprep.subr.bf16.mxu1 %v830_v30  ;;  %v269_v9 = vld [vmem:[%s952_s17 + $0x1f8] sm:$0xff]  ;;  %v846_v12 = vpack.c.bf16 %v267_v7, %v259_v6  ;;  %v266_v14 = vld [vmem:[%s952_s17 + $0x1e0] sm:$0xff]  ;;  %v260_v15 = vld [vmem:[%s952_s17 + $0x1b0] sm:$0xff] }
  0x30   : > { %v878_v16 = vpack.c.bf16 %v269_v9, %v261_v8  ;;  %v268_v17 = vld [vmem:[%s952_s17 + $0x1f0] sm:$0xff]  ;;  %v275_v18 = vld [vmem:[%s952_s17 + $0x228] sm:$0xff]  ;;  %v277_v19 = vld [vmem:[%s952_s17 + $0x238] sm:$0xff]  ;;  %v848_v21 = vpack.c.bf16 %v266_v14, %v258_v13  ;;  %v337_v6 = vshrl.u32 %v336_v5, 7 }
  0x31   : > { %801 = vmatpush1.bf16.msra.mxu0 %v800_v36  ;;  %v285_v20 = vld [vmem:[%s952_s17 + $0x278] sm:$0xff]  ;;  %v880_v22 = vpack.c.bf16 %v268_v17, %v260_v15  ;;  %v274_v24 = vld [vmem:[%s952_s17 + $0x220] sm:$0xff]  ;;  %v276_v26 = vld [vmem:[%s952_s17 + $0x230] sm:$0xff] }
  0x32   : > { %833 = vmatpush1.bf16.msra.mxu1 %v832_v37  ;;  %835 = vmatprep.subr.bf16.mxu0 %v834_v38  ;;  %v282_v25 = vld [vmem:[%s952_s17 + $0x260] sm:$0xff]  ;;  %v882_v27 = vpack.c.bf16 %v285_v20, %v277_v19  ;;  %v284_v28 = vld [vmem:[%s952_s17 + $0x270] sm:$0xff]  ;;  %v291_v29 = vld [vmem:[%s952_s17 + $0x2a8] sm:$0xff]  ;;  %v338_v7 = vsub.s32 0, %v337_v6  ;;  %v346_v9 = vsub.s32 2, %v337_v6 }
  0x33   : > { %867 = vmatprep.subr.bf16.mxu1 %v866_v42  ;;  %v299_v30 = vld [vmem:[%s952_s17 + $0x2e8] sm:$0xff]  ;;  %v293_v31 = vld [vmem:[%s952_s17 + $0x2b8] sm:$0xff]  ;;  %v852_v33 = vpack.c.bf16 %v282_v25, %v274_v24  ;;  %v884_v34 = vpack.c.bf16 %v284_v28, %v276_v26  ;;  %v290_v36 = vld [vmem:[%s952_s17 + $0x2a0] sm:$0xff]  ;;  %v354_v26 = vsub.s32 4, %v337_v6  ;;  %v358_v28 = vsub.s32 5, %v337_v6 }
  0x34   : > { %441 = vmatmul.mubr.f32.vlgmr.msra.gmra.mrb[0].mxu0 %v1036_v48  ;;  %v301_v32 = vld [vmem:[%s952_s17 + $0x2f8] sm:$0xff]  ;;  %v854_v35 = vpack.c.bf16 %v299_v30, %v291_v29  ;;  %v298_v37 = vld [vmem:[%s952_s17 + $0x2e0] sm:$0xff]  ;;  %v292_v38 = vld [vmem:[%s952_s17 + $0x2b0] sm:$0xff]  ;;  %v366_v29 = vsub.s32 7, %v337_v6 }
  0x35   : > { %512 = vmatmul.mubr.f32.vlgmr.msra.gmra.mrb[0].mxu1 %v1036_v48  ;;  %837 = vmatpush1.bf16.msra.mxu0 %v836_v49  ;;  %v886_v39 = vpack.c.bf16 %v301_v32, %v293_v31  ;;  %v300_v40 = vld [vmem:[%s952_s17 + $0x2f0] sm:$0xff]  ;;  %v307_v41 = vld [vmem:[%s952_s17 + $0x328] sm:$0xff]  ;;  %v309_v43 = vld [vmem:[%s952_s17 + $0x338] sm:$0xff]  ;;  %v856_v45 = vpack.c.bf16 %v298_v37, %v290_v36 }
  0x36   : > { %869 = vmatpush1.bf16.msra.mxu1 %v868_v50  ;;  %839 = vmatprep.subr.bf16.mxu0 %v838_v51  ;;  %v315_v42 = vld [vmem:[%s952_s17 + $0x368] sm:$0xff]  ;;  %v317_v44 = vld [vmem:[%s952_s17 + $0x378] sm:$0xff]  ;;  %v888_v46 = vpack.c.bf16 %v300_v40, %v292_v38  ;;  %v306_v49 = vld [vmem:[%s952_s17 + $0x320] sm:$0xff] }
  0x37   : > { %871 = vmatprep.subr.bf16.mxu1 %v870_v55  ;;  %582 = vmatprep.mubr.f32.mxu0 %v915_v0  ;;  %v858_v47 = vpack.c.bf16 %v315_v42, %v307_v41  ;;  %v314_v50 = vld [vmem:[%s952_s17 + $0x360] sm:$0xff]  ;;  %v308_v51 = vld [vmem:[%s952_s17 + $0x330] sm:$0xff]  ;;  %v890_v52 = vpack.c.bf16 %v317_v44, %v309_v43  ;;  %v323_v54 = vld [vmem:[%s952_s17 + $0x3a8] sm:$0xff] }
  0x38   : > { %653 = vmatprep.mubr.f32.mxu1 %v915_v0  ;;  %v283_v0 = vld [vmem:[%s952_s17 + $0x268] sm:$0xff]  ;;  %v316_v53 = vld [vmem:[%s952_s17 + $0x370] sm:$0xff]  ;;  %v325_v56 = vld [vmem:[%s952_s17 + $0x3b8] sm:$0xff]  ;;  %v860_v58 = vpack.c.bf16 %v314_v50, %v306_v49 }
  0x39   : > { %841 = vmatpush1.bf16.msra.mxu0 %v840_v61  ;;  %v850_v23 = vpack.c.bf16 %v283_v0, %v275_v18  ;;  %v331_v55 = vld [vmem:[%s952_s17 + $0x3e8] sm:$0xff]  ;;  %v333_v57 = vld [vmem:[%s952_s17 + $0x3f8] sm:$0xff]  ;;  %v892_v59 = vpack.c.bf16 %v316_v53, %v308_v51  ;;  %v322_v61 = vld [vmem:[%s952_s17 + $0x3a0] sm:$0xff] }
  0x3a   : > { %873 = vmatpush1.bf16.msra.mxu1 %v872_v62  ;;  %843 = vmatprep.subr.bf16.mxu0 %v842_v63  ;;  %v862_v60 = vpack.c.bf16 %v331_v55, %v323_v54  ;;  %v330_v62 = vld [vmem:[%s952_s17 + $0x3e0] sm:$0xff]  ;;  %v894_v63 = vpack.c.bf16 %v333_v57, %v325_v56  ;;  %v324_v1 = vld [vmem:[%s952_s17 + $0x3b0] sm:$0xff] }
  0x3b   : > { %875 = vmatprep.subr.bf16.mxu1 %v874_v4  ;;  %v332_v2 = vld [vmem:[%s952_s17 + $0x3f0] sm:$0xff]  ;;  %v864_v3 = vpack.c.bf16 %v330_v62, %v322_v61  ;;  %v334_v8 = vld [vmem:[%s199_s24] sm:$0xff] }
  0x3c   : > { %v896_v4 = vpack.c.bf16 %v332_v2, %v324_v1  ;;  %v347_v13 = vrot.slane %v334_v8, %v346_v9  ;;  %v355_v30 = vrot.slane %v334_v8, %v354_v26  ;;  %v359_v32 = vrot.slane %v334_v8, %v358_v28 }
  0x3d   : > { %845 = vmatpush1.bf16.msra.mxu0 %v844_v10  ;;  %v342_v10 = vsub.s32 1, %v337_v6 }
  0x3e   : > { %877 = vmatpush1.bf16.msra.mxu1 %v876_v11  ;;  %847 = vmatprep.subr.bf16.mxu0 %v846_v12  ;;  %v350_v11 = vsub.s32 3, %v337_v6  ;;  %v339_v12 = vrot.slane %v334_v8, %v338_v7 }
  0x3f   : > { %879 = vmatprep.subr.bf16.mxu1 %v878_v16  ;;  %v343_v14 = vrot.slane %v334_v8, %v342_v10 }
  0x40   : > { %v351_v15 = vrot.slane %v334_v8, %v350_v11 }
  0x41   : > { %849 = vmatpush1.bf16.msra.mxu0 %v848_v21 }
  0x42   : > { %881 = vmatpush1.bf16.msra.mxu1 %v880_v22  ;;  %851 = vmatprep.subr.bf16.mxu0 %v850_v23 }
  0x43   : > { %883 = vmatprep.subr.bf16.mxu1 %v882_v27  ;;  %v362_v27 = vsub.s32 6, %v337_v6 }
  0x45   : > { %853 = vmatpush1.bf16.msra.mxu0 %v852_v33  ;;  %v363_v31 = vrot.slane %v334_v8, %v362_v27  ;;  %v367_v33 = vrot.slane %v334_v8, %v366_v29 }
  0x46   : > { %885 = vmatpush1.bf16.msra.mxu1 %v884_v34  ;;  %855 = vmatprep.subr.bf16.mxu0 %v854_v35 }
  0x47   : > { %887 = vmatprep.subr.bf16.mxu1 %v886_v39 }
  0x49   : > { %857 = vmatpush1.bf16.msra.mxu0 %v856_v45 }
  0x4a   : > { %889 = vmatpush1.bf16.msra.mxu1 %v888_v46  ;;  %859 = vmatprep.subr.bf16.mxu0 %v858_v47 }
  0x4b   : > { %891 = vmatprep.subr.bf16.mxu1 %v890_v52 }
  0x4d   : > { %861 = vmatpush1.bf16.msra.mxu0 %v860_v58 }
  0x4e   : > { %893 = vmatpush1.bf16.msra.mxu1 %v892_v59  ;;  %863 = vmatprep.subr.bf16.mxu0 %v862_v60 }
  0x4f   : > { %895 = vmatprep.subr.bf16.mxu1 %v894_v63 }
  0x51   : > { %865 = vmatpush1.bf16.msra.mxu0 %v864_v3 }
  0x52   : > { %897 = vmatpush1.bf16.msra.mxu1 %v896_v4 }
  0x54   : > { %583 = vmatmul.mubr.f32.vlgmr.msra.gmra.mrb[2].mxu0 %v1036_v48 }
  0x55   : > { %654 = vmatmul.mubr.f32.vlgmr.msra.gmra.mrb[2].mxu1 %v1036_v48 }
 0x107   : > { %v442_v16 = vpop.f32.mrb[0].mxu0 }
 0x108   : > { %v443_v17 = vadd.f32 %v442_v16, %v339_v12  ;;  %v513_v48 = vpop.f32.mrb[0].mxu1  ;;  %v444_v18 = vpop.f32.mrb[1].mxu0 }
 0x109   : > { %v514_v0 = vadd.f32 %v513_v48, %v347_v13  ;;  %v445_v19 = vadd.f32 %v444_v18, %v343_v14  ;;  %v515_v20 = vpop.f32.mrb[1].mxu1 }
 0x10a   : > { %v660_v21 = vmax.f32 %v443_v17, 0.0  ;;  %v516_v22 = vadd.f32 %v515_v20, %v351_v15 }
 0x10b   : > { %v662_v23 = vmax.f32 %v514_v0, 0.0  ;;  %v661_v24 = vmax.f32 %v445_v19, 0.0 }
 0x10c   : > { %668 = vst [vmem:[%s1105_s28] sm:$0xff] %v660_v21  ;;  %v663_v25 = vmax.f32 %v516_v22, 0.0 }
 0x10d   : > { %670 = vst [vmem:[%s1105_s28 + $0x10] sm:$0xff] %v662_v23  ;;  %669 = vst [vmem:[%s1105_s28 + $0x8] sm:$0xff] %v661_v24 }
 0x10e   : > { %671 = vst [vmem:[%s1105_s28 + $0x18] sm:$0xff] %v663_v25 }
 0x127   : > { %v584_v34 = vpop.f32.mrb[2].mxu0 }
 0x128   : > { %v585_v35 = vadd.f32 %v584_v34, %v355_v30  ;;  %v655_v36 = vpop.f32.mrb[2].mxu1  ;;  %v586_v37 = vpop.f32.mrb[3].mxu0 }
 0x129   : > { %v656_v38 = vadd.f32 %v655_v36, %v363_v31  ;;  %v587_v39 = vadd.f32 %v586_v37, %v359_v32  ;;  %v657_v40 = vpop.f32.mrb[3].mxu1 }
 0x12a   : > { %v664_v41 = vmax.f32 %v585_v35, 0.0  ;;  %v658_v42 = vadd.f32 %v657_v40, %v367_v33 }
 0x12b   : > { %v666_v43 = vmax.f32 %v656_v38, 0.0  ;;  %v665_v44 = vmax.f32 %v587_v39, 0.0 }
 0x12c   : > { %672 = vst [vmem:[%s1105_s28 + $0x20] sm:$0xff] %v664_v41  ;;  %v667_v45 = vmax.f32 %v658_v42, 0.0 }
 0x12d   : > { %674 = vst [vmem:[%s1105_s28 + $0x30] sm:$0xff] %v666_v43  ;;  %673 = vst [vmem:[%s1105_s28 + $0x28] sm:$0xff] %v665_v44 }
 0x12e   : > { %675 = vst [vmem:[%s1105_s28 + $0x38] sm:$0xff] %v667_v45 }
 0x12f PF: > { %s13_s12 = sadd.s32 1, %s913_s12  }
 0x130   : > { %p10_p4 = scmp.ge.s32.totalorder %s13_s12, 4  }
 0x132   :  { %12 = sbr.rel (!%p10_p4) target bundleno = 1 (0x1), region = 68 }

</bundles_post_ra>
